<compile_context>
chip_gen: v5e
topology: v5e:2x2
jax: 0.10.0
libtpu: 0.0.40
codegen_flags: <defaults>
</compile_context>

<pallas_src>
import jax
import jax.numpy as jnp
from jax.experimental import pallas as pl
from jax.experimental.pallas import tpu as pltpu

_LANES = 128
_SUBLANES = 8
_SMALL_INPUT_ELEMS = 1 << 20  # below this, plain jnp is faster than a kernel launch


def _chip_config():
    """Per-generation tiling / megacore / VMEM-limit config (safe fallback)."""
    kind = ""
    try:
        kind = jax.devices()[0].device_kind.lower()
    except Exception:
        pass
    if "v7" in kind or "7x" in kind:
        # 2 TensorCores/chip, 64 MiB VMEM per TC: keep in-flight well under 32 MiB/TC.
        return {"num_chunks": 2, "block_rows": 8192, "vmem_limit": 48 * 1024 * 1024}
    if "v5 lite" in kind or "v5e" in kind or "v5lite" in kind:
        # 1 TC, 128 MiB physical VMEM; raise the 16 MiB default scoped limit.
        return {"num_chunks": 1, "block_rows": 8192, "vmem_limit": 64 * 1024 * 1024}
    # v6e / other single-TC chips (128 MiB physical VMEM, 32 MiB default scoped).
    return {"num_chunks": 1, "block_rows": 8192, "vmem_limit": 64 * 1024 * 1024}


def _make_sse_kernel(n_preds, block_rows, blocks_per_chunk, valid_rows, needs_mask):
    """Kernel refs = (pred_0, [pred_1,] targets, out_0, [out_1])."""

    def kernel(*refs):
        pred_refs = refs[:n_preds]
        tgt_ref = refs[n_preds]
        out_refs = refs[n_preds + 1:]

        c = pl.program_id(0)   # chunk axis ("parallel" -> megacore on v7x)
        i = pl.program_id(1)   # block-within-chunk axis ("arbitrary", reduction)

        # Fresh resident accumulator block at the start of each chunk.
        @pl.when(i == 0)
        def _():
            for o in out_refs:
                o[...] = jnp.zeros_like(o)

        def accumulate(mask):
            tgt = tgt_ref[...].astype(jnp.float32)
            for j in range(n_preds):
                d = pred_refs[j][...].astype(jnp.float32) - tgt
                sq = d * d
                if mask is not None:
                    sq = jnp.where(mask, sq, jnp.float32(0.0))
                # Sublane-group reduction only: (block_rows,128) -> (G,8,128) -> (8,128).
                # Pure vreg-wise VPU adds; no cross-lane work in the hot loop.
                partial = sq.reshape(
                    block_rows // _SUBLANES, _SUBLANES, _LANES).sum(axis=0)
                out_refs[j][...] += partial

        if needs_mask:
            blk = c * blocks_per_chunk + i
            # Only blocks overlapping (or past) the valid-row boundary need masking:
            # edge-block garbage rows / clamped duplicate grid blocks must not count.
            is_edge = (blk + 1) * block_rows > valid_rows

            @pl.when(jnp.logical_not(is_edge))
            def _():
                accumulate(None)

            @pl.when(is_edge)
            def _():
                rid = (jax.lax.broadcasted_iota(jnp.int32, (block_rows, _LANES), 0)
                       + blk * block_rows)
                accumulate(rid < valid_rows)
        else:
            accumulate(None)

    return kernel


def _sum_squared_errors(preds, targets):
    """Fused Pallas SSE: returns a tuple of sum((pred_j - targets)^2) scalars."""
    n = targets.size
    for p in preds:
        assert p.shape == targets.shape

    t_flat = targets.reshape(-1)
    p_flats = [p.reshape(-1) for p in preds]

    # Ragged lane tail (< 128 elems): sum it in the wrapper instead of jnp.pad-ing
    # (padding would write a full extra copy of every array before the kernel).
    # TODO(synk): a fully zero-copy ragged path would mask the lane tail in-kernel;
    # the main-body slice below still copies when n is not lane-aligned.
    rem = n % _LANES
    tail_sses = None
    if rem:
        n_main = n - rem
        tail_t = t_flat[n_main:].astype(jnp.float32)
        tail_sses = [jnp.sum((pf[n_main:].astype(jnp.float32) - tail_t) ** 2)
                     for pf in p_flats]
        t_flat = t_flat[:n_main]
        p_flats = [pf[:n_main] for pf in p_flats]

    rows = t_flat.size // _LANES

    # Min row granularity depends on the narrowest dtype ((8,128) f32 / (16,128) bf16).
    min_item = min(jnp.dtype(a.dtype).itemsize for a in p_flats + [t_flat])
    row_mult = _SUBLANES * max(1, 4 // int(min_item))

    def _combine(sses):
        if tail_sses is not None:
            sses = [s + t for s, t in zip(sses, tail_sses)]
        return tuple(sses)

    if rows < row_mult:
        # Too small for a legal tile: plain jnp (only hit when forced onto this path).
        t32 = t_flat.astype(jnp.float32)
        return _combine([jnp.sum((pf.astype(jnp.float32) - t32) ** 2)
                         for pf in p_flats])

    cfg = _chip_config()
    block_rows = min(cfg["block_rows"], (rows // row_mult) * row_mult)
    block_rows = max(block_rows, row_mult)

    flats = [pf.reshape(rows, _LANES) for pf in p_flats]
    tgt2 = t_flat.reshape(rows, _LANES)

    total_blocks = pl.cdiv(rows, block_rows)
    num_chunks = cfg["num_chunks"] if total_blocks >= cfg["num_chunks"] else 1
    blocks_per_chunk = pl.cdiv(total_blocks, num_chunks)
    padded_blocks = num_chunks * blocks_per_chunk
    needs_mask = (padded_blocks * block_rows) != rows

    n_preds = len(preds)
    kernel = _make_sse_kernel(n_preds, block_rows, blocks_per_chunk, rows, needs_mask)

    if padded_blocks == total_blocks:
        def in_map(c, i):
            return (c * blocks_per_chunk + i, 0)
    else:
        # Clamp grid-padding blocks onto the last real block; their contribution
        # is fully zeroed by the in-kernel edge mask.
        def in_map(c, i):
            return (jnp.minimum(c * blocks_per_chunk + i, total_blocks - 1), 0)

    in_specs = [pl.BlockSpec((block_rows, _LANES), in_map)
                for _ in range(n_preds + 1)]
    out_specs = tuple(pl.BlockSpec((_SUBLANES, _LANES), lambda c, i: (c, 0))
                      for _ in range(n_preds))
    out_shape = tuple(
        jax.ShapeDtypeStruct((num_chunks * _SUBLANES, _LANES), jnp.float32)
        for _ in range(n_preds))

    partials = pl.pallas_call(
        kernel,
        out_shape=out_shape,
        grid_spec=pltpu.PrefetchScalarGridSpec(
            num_scalar_prefetch=0,
            grid=(num_chunks, blocks_per_chunk),
            in_specs=in_specs,
            out_specs=out_specs,
        ),
        compiler_params=pltpu.CompilerParams(
            dimension_semantics=("parallel", "arbitrary"),
            vmem_limit_bytes=cfg["vmem_limit"]),
    )(*flats, tgt2)

    if not isinstance(partials, (tuple, list)):
        partials = (partials,)
    # Final cross-lane / cross-chunk reduce is tiny (num_chunks*8*128 elements).
    return _combine([jnp.sum(p) for p in partials])


def nerf_loss(inputs, targets, *, pallas_min_elems=_SMALL_INPUT_ELEMS):
    """Mirror of NerfLoss.forward: mean-MSE per prediction, summed."""
    names = ['coarse_color']
    preds = [inputs['rgb_coarse']]
    if 'rgb_fine' in inputs:
        names.append('fine_color')
        preds.append(inputs['rgb_fine'])

    if targets.size < pallas_min_elems:
        # Small batches: XLA-fused path; kernel-launch + grid overhead dominates.
        t32 = targets.astype(jnp.float32)
        sses = tuple(jnp.sum((p.astype(jnp.float32) - t32) ** 2) for p in preds)
    else:
        sses = _sum_squared_errors(preds, targets)

    loss_dict = {}
    for name, pred, sse in zip(names, preds, sses):
        loss_dict[name] = sse / jnp.float32(pred.size)
    loss = sum(l for l in loss_dict.values())
    return loss, loss_dict


if __name__ == "__main__":
    key = jax.random.PRNGKey(0)
    k1, k2, k3 = jax.random.split(key, 3)

    num_rays = 512  # small NeRF-style batch of rays, RGB channels = 3
    rgb_coarse = jax.random.uniform(k1, (num_rays, 3), dtype=jnp.float32)
    rgb_fine = jax.random.uniform(k2, (num_rays, 3), dtype=jnp.float32)
    targets = jax.random.uniform(k3, (num_rays, 3), dtype=jnp.float32)

    ref_c = jnp.mean((rgb_coarse - targets) ** 2)
    ref_f = jnp.mean((rgb_fine - targets) ** 2)
    ref_loss = ref_c + ref_f

    # Force the Pallas path (pallas_min_elems=0) so the kernel is exercised at
    # demo size; in production the auto-threshold routes small batches to XLA.
    inputs = {'rgb_coarse': rgb_coarse, 'rgb_fine': rgb_fine}
    loss, loss_dict = nerf_loss(inputs, targets, pallas_min_elems=0)
    loss = jax.block_until_ready(loss)
    assert jnp.allclose(loss, ref_loss, rtol=1e-5, atol=1e-6)
    assert jnp.allclose(loss_dict['coarse_color'], ref_c, rtol=1e-5, atol=1e-6)
    assert jnp.allclose(loss_dict['fine_color'], ref_f, rtol=1e-5, atol=1e-6)

    # Coarse only (single-prediction Pallas path).
    loss_c_only, loss_dict_c = nerf_loss({'rgb_coarse': rgb_coarse}, targets,
                                         pallas_min_elems=0)
    loss_c_only = jax.block_until_ready(loss_c_only)
    assert 'fine_color' not in loss_dict_c
    assert jnp.allclose(loss_c_only, ref_c, rtol=1e-5, atol=1e-6)

    # Default threshold: this demo-size batch takes the small-input XLA path.
    loss_small, _ = nerf_loss(inputs, targets)
    loss_small = jax.block_until_ready(loss_small)
    assert jnp.allclose(loss_small, ref_loss, rtol=1e-5, atol=1e-6)

    print("KERNEL_OK")
</pallas_src>

<mosaic_0001>
module attributes {stable_mosaic.version = 11 : i64} {
  func.func @kernel(%arg0: i32, %arg1: i32, %arg2: memref<8x128xf32, #tpu.memory_space<vmem>>, %arg3: memref<8x128xf32, #tpu.memory_space<vmem>>, %arg4: memref<8x128xf32, #tpu.memory_space<vmem>>, %arg5: memref<8x128xf32, #tpu.memory_space<vmem>>, %arg6: memref<8x128xf32, #tpu.memory_space<vmem>>) attributes {dimension_semantics = [#tpu.dimension_semantics<parallel>, #tpu.dimension_semantics<arbitrary>], iteration_bounds = array<i64: 1, 2>, scalar_prefetch = 0 : i64, scratch_operands = 0 : i64, tpu.core_type = #tpu.core_type<tc>, window_params = [{transform_indices = @transform_0, window_bounds = array<i64: 8, 128>}, {transform_indices = @transform_1, window_bounds = array<i64: 8, 128>}, {transform_indices = @transform_2, window_bounds = array<i64: 8, 128>}, {transform_indices = @transform_3, window_bounds = array<i64: 8, 128>}, {transform_indices = @transform_4, window_bounds = array<i64: 8, 128>}]} {
    %c0_i32 = arith.constant 0 : i32
    %0 = arith.cmpi eq, %arg1, %c0_i32 : i32
    %1 = arith.extui %0 : i1 to i32
    %c0_i32_0 = arith.constant 0 : i32
    %2 = arith.cmpi ne, %1, %c0_i32_0 : i32
    scf.if %2 {
      %cst = arith.constant 0.000000e+00 : f32
      %13 = vector.broadcast %cst : f32 to vector<8x128xf32>
      %c0 = arith.constant 0 : index
      %c0_3 = arith.constant 0 : index
      %14 = vector.load %arg5[%c0, %c0_3] : memref<8x128xf32, #tpu.memory_space<vmem>>, vector<8x128xf32>
      tpu.vector_store %arg5[%c0, %c0_3], %13 {strides = array<i32>} : memref<8x128xf32, #tpu.memory_space<vmem>>, vector<8x128xf32>,
      %cst_4 = arith.constant 0.000000e+00 : f32
      %15 = vector.broadcast %cst_4 : f32 to vector<8x128xf32>
      %c0_5 = arith.constant 0 : index
      %c0_6 = arith.constant 0 : index
      %16 = vector.load %arg6[%c0_5, %c0_6] : memref<8x128xf32, #tpu.memory_space<vmem>>, vector<8x128xf32>
      tpu.vector_store %arg6[%c0_5, %c0_6], %15 {strides = array<i32>} : memref<8x128xf32, #tpu.memory_space<vmem>>, vector<8x128xf32>,
    } else {
    }
    %c2_i32 = arith.constant 2 : i32
    %3 = arith.muli %arg0, %c2_i32 : i32
    %4 = arith.addi %3, %arg1 : i32
    %c1_i32 = arith.constant 1 : i32
    %5 = arith.addi %4, %c1_i32 : i32
    %c8_i32 = arith.constant 8 : i32
    %6 = arith.muli %5, %c8_i32 : i32
    %c12_i32 = arith.constant 12 : i32
    %7 = arith.cmpi sgt, %6, %c12_i32 : i32
    %true = arith.constant true
    %8 = arith.xori %7, %true : i1
    %9 = arith.extui %8 : i1 to i32
    %c0_i32_1 = arith.constant 0 : i32
    %10 = arith.cmpi ne, %9, %c0_i32_1 : i32
    scf.if %10 {
      %c0 = arith.constant 0 : index
      %c0_3 = arith.constant 0 : index
      %13 = vector.load %arg4[%c0, %c0_3] : memref<8x128xf32, #tpu.memory_space<vmem>>, vector<8x128xf32>
      %c0_4 = arith.constant 0 : index
      %c0_5 = arith.constant 0 : index
      %14 = vector.load %arg2[%c0_4, %c0_5] : memref<8x128xf32, #tpu.memory_space<vmem>>, vector<8x128xf32>
      %15 = arith.subf %14, %13 : vector<8x128xf32>
      %16 = arith.mulf %15, %15 : vector<8x128xf32>
      %17 = vector.shape_cast %16 : vector<8x128xf32> to vector<1x8x128xf32>
      %cst = arith.constant dense<0.000000e+00> : vector<8x128xf32>
      %18 = vector.multi_reduction <add>, %17, %cst [0] : vector<1x8x128xf32> to vector<8x128xf32>
      %c0_6 = arith.constant 0 : index
      %c0_7 = arith.constant 0 : index
      %19 = vector.load %arg5[%c0_6, %c0_7] : memref<8x128xf32, #tpu.memory_space<vmem>>, vector<8x128xf32>
      %20 = arith.addf %19, %18 : vector<8x128xf32>
      %c0_8 = arith.constant 0 : index
      %c0_9 = arith.constant 0 : index
      %21 = vector.load %arg5[%c0_8, %c0_9] : memref<8x128xf32, #tpu.memory_space<vmem>>, vector<8x128xf32>
      tpu.vector_store %arg5[%c0_8, %c0_9], %20 {strides = array<i32>} : memref<8x128xf32, #tpu.memory_space<vmem>>, vector<8x128xf32>,
      %c0_10 = arith.constant 0 : index
      %c0_11 = arith.constant 0 : index
      %22 = vector.load %arg3[%c0_10, %c0_11] : memref<8x128xf32, #tpu.memory_space<vmem>>, vector<8x128xf32>
      %23 = arith.subf %22, %13 : vector<8x128xf32>
      %24 = arith.mulf %23, %23 : vector<8x128xf32>
      %25 = vector.shape_cast %24 : vector<8x128xf32> to vector<1x8x128xf32>
      %cst_12 = arith.constant dense<0.000000e+00> : vector<8x128xf32>
      %26 = vector.multi_reduction <add>, %25, %cst_12 [0] : vector<1x8x128xf32> to vector<8x128xf32>
      %c0_13 = arith.constant 0 : index
      %c0_14 = arith.constant 0 : index
      %27 = vector.load %arg6[%c0_13, %c0_14] : memref<8x128xf32, #tpu.memory_space<vmem>>, vector<8x128xf32>
      %28 = arith.addf %27, %26 : vector<8x128xf32>
      %c0_15 = arith.constant 0 : index
      %c0_16 = arith.constant 0 : index
      %29 = vector.load %arg6[%c0_15, %c0_16] : memref<8x128xf32, #tpu.memory_space<vmem>>, vector<8x128xf32>
      tpu.vector_store %arg6[%c0_15, %c0_16], %28 {strides = array<i32>} : memref<8x128xf32, #tpu.memory_space<vmem>>, vector<8x128xf32>,
    } else {
    }
    %11 = arith.extui %7 : i1 to i32
    %c0_i32_2 = arith.constant 0 : i32
    %12 = arith.cmpi ne, %11, %c0_i32_2 : i32
    scf.if %12 {
      %13 = tpu.iota {dimensions = array<i32: 0>} : vector<8x128xi32>
      %c8_i32_3 = arith.constant 8 : i32
      %14 = arith.muli %4, %c8_i32_3 : i32
      %15 = vector.broadcast %14 : i32 to vector<8x128xi32>
      %16 = arith.addi %13, %15 : vector<8x128xi32>
      %c12_i32_4 = arith.constant 12 : i32
      %17 = vector.broadcast %c12_i32_4 : i32 to vector<8x128xi32>
      %18 = arith.cmpi slt, %16, %17 : vector<8x128xi32>
      %c0 = arith.constant 0 : index
      %c0_5 = arith.constant 0 : index
      %19 = vector.load %arg4[%c0, %c0_5] : memref<8x128xf32, #tpu.memory_space<vmem>>, vector<8x128xf32>
      %c0_6 = arith.constant 0 : index
      %c0_7 = arith.constant 0 : index
      %20 = vector.load %arg2[%c0_6, %c0_7] : memref<8x128xf32, #tpu.memory_space<vmem>>, vector<8x128xf32>
      %21 = arith.subf %20, %19 : vector<8x128xf32>
      %22 = arith.mulf %21, %21 : vector<8x128xf32>
      %cst = arith.constant 0.000000e+00 : f32
      %23 = vector.broadcast %cst : f32 to vector<8x128xf32>
      %24 = arith.select %18, %22, %23 : vector<8x128xi1>, vector<8x128xf32>
      %25 = vector.shape_cast %24 : vector<8x128xf32> to vector<1x8x128xf32>
      %cst_8 = arith.constant dense<0.000000e+00> : vector<8x128xf32>
      %26 = vector.multi_reduction <add>, %25, %cst_8 [0] : vector<1x8x128xf32> to vector<8x128xf32>
      %c0_9 = arith.constant 0 : index
      %c0_10 = arith.constant 0 : index
      %27 = vector.load %arg5[%c0_9, %c0_10] : memref<8x128xf32, #tpu.memory_space<vmem>>, vector<8x128xf32>
      %28 = arith.addf %27, %26 : vector<8x128xf32>
      %c0_11 = arith.constant 0 : index
      %c0_12 = arith.constant 0 : index
      %29 = vector.load %arg5[%c0_11, %c0_12] : memref<8x128xf32, #tpu.memory_space<vmem>>, vector<8x128xf32>
      tpu.vector_store %arg5[%c0_11, %c0_12], %28 {strides = array<i32>} : memref<8x128xf32, #tpu.memory_space<vmem>>, vector<8x128xf32>,
      %c0_13 = arith.constant 0 : index
      %c0_14 = arith.constant 0 : index
      %30 = vector.load %arg3[%c0_13, %c0_14] : memref<8x128xf32, #tpu.memory_space<vmem>>, vector<8x128xf32>
      %31 = arith.subf %30, %19 : vector<8x128xf32>
      %32 = arith.mulf %31, %31 : vector<8x128xf32>
      %cst_15 = arith.constant 0.000000e+00 : f32
      %33 = vector.broadcast %cst_15 : f32 to vector<8x128xf32>
      %34 = arith.select %18, %32, %33 : vector<8x128xi1>, vector<8x128xf32>
      %35 = vector.shape_cast %34 : vector<8x128xf32> to vector<1x8x128xf32>
      %cst_16 = arith.constant dense<0.000000e+00> : vector<8x128xf32>
      %36 = vector.multi_reduction <add>, %35, %cst_16 [0] : vector<1x8x128xf32> to vector<8x128xf32>
      %c0_17 = arith.constant 0 : index
      %c0_18 = arith.constant 0 : index
      %37 = vector.load %arg6[%c0_17, %c0_18] : memref<8x128xf32, #tpu.memory_space<vmem>>, vector<8x128xf32>
      %38 = arith.addf %37, %36 : vector<8x128xf32>
      %c0_19 = arith.constant 0 : index
      %c0_20 = arith.constant 0 : index
      %39 = vector.load %arg6[%c0_19, %c0_20] : memref<8x128xf32, #tpu.memory_space<vmem>>, vector<8x128xf32>
      tpu.vector_store %arg6[%c0_19, %c0_20], %38 {strides = array<i32>} : memref<8x128xf32, #tpu.memory_space<vmem>>, vector<8x128xf32>,
    } else {
    }
    return
  }
  func.func @transform_0(%arg0: i32, %arg1: i32) -> (i32, i32) {
    %c2_i32 = arith.constant 2 : i32
    %0 = arith.muli %arg0, %c2_i32 : i32
    %1 = arith.addi %0, %arg1 : i32
    %c0_i32 = arith.constant 0 : i32
    %c0_i32_0 = arith.constant 0 : i32
    return %1, %c0_i32 : i32, i32
  }
  func.func @transform_1(%arg0: i32, %arg1: i32) -> (i32, i32) {
    %c2_i32 = arith.constant 2 : i32
    %0 = arith.muli %arg0, %c2_i32 : i32
    %1 = arith.addi %0, %arg1 : i32
    %c0_i32 = arith.constant 0 : i32
    %c0_i32_0 = arith.constant 0 : i32
    return %1, %c0_i32 : i32, i32
  }
  func.func @transform_2(%arg0: i32, %arg1: i32) -> (i32, i32) {
    %c2_i32 = arith.constant 2 : i32
    %0 = arith.muli %arg0, %c2_i32 : i32
    %1 = arith.addi %0, %arg1 : i32
    %c0_i32 = arith.constant 0 : i32
    %c0_i32_0 = arith.constant 0 : i32
    return %1, %c0_i32 : i32, i32
  }
  func.func @transform_3(%arg0: i32, %arg1: i32) -> (i32, i32) {
    %c0_i32 = arith.constant 0 : i32
    %c0_i32_0 = arith.constant 0 : i32
    return %arg0, %c0_i32 : i32, i32
  }
  func.func @transform_4(%arg0: i32, %arg1: i32) -> (i32, i32) {
    %c0_i32 = arith.constant 0 : i32
    %c0_i32_0 = arith.constant 0 : i32
    return %arg0, %c0_i32 : i32, i32
  }
}

</mosaic_0001>

<bundles_post_ra>
// kernel: tpu_custom_call.1
= control target key start
LH: loop header
LB: loop body
LE: loop exit
PB: predicated region body
PF: predicated region fallthrough
CT: control target
= control target key end

     0   :  { %s1014_s0 = inlined_call_operand.hbm [shape: f32[12,128], index: 0, kind: input, shape index: {}]   ;;  %s1015_s1 = inlined_call_operand.hbm [shape: f32[12,128], index: 1, kind: input, shape index: {}]   ;;  %s1016_s2 = inlined_call_operand.hbm [shape: f32[12,128], index: 2, kind: input, shape index: {}]   ;;  %s1017_s3 = inlined_call_operand.hbm [shape: f32[8,128], index: 3, kind: output, shape index: {0}]   ;;  %s1018_s4 = inlined_call_operand.hbm [shape: f32[8,128], index: 4, kind: output, shape index: {1}]  }
   0x1   :  { %1020 = sst [smem:[#allocation16_spill]] %s1015_s1 }
   0x2   :  { %10 = vsyncpa [#allocation3], 0 }
   0x3   :  { %12 = vsyncpa [#allocation3 + $0x1], 0 }
   0x4   :  { %13 = vsyncpa [#allocation6], 0 }
   0x5   :  { %15 = vsyncpa [#allocation6 + $0x1], 0 }
   0x6   :  { %16 = vsyncpa [#allocation4], 0 }
   0x7   :  { %17 = vsyncpa [#allocation10], 0  ;;  %s872_s15 = smov 0   ;;  %s874_s16 = smov 0  }
   0x8   :  { %s876_s17 = smov 0   ;;  %s878_s18 = smov 0  }
   0x9   :  { %s880_s19 = smov 0   ;;  %s882_s20 = smov 0  }
   0xa LB: > { %s901_s21 = sadd.s32 4294967295, %s842_s20   ;;  %s32_s22 = sadd.s32 1, %s838_s19  ;;  %s842_s20 = sphi %s882_s20, %s23_s20   ;;  %s838_s19 = sphi %s880_s19, %s1031_s19   ;;  %s834_s18 = sphi %s878_s18, %s1030_s18   ;;  %s830_s17 = sphi %s876_s17, %s1029_s17   ;;  %s826_s16 = sphi %s874_s16, %s1028_s16   ;;  %s822_s15 = sphi %s872_s15, %s1027_s15  }
   0xb   : > { %p33_p0 = scmp.ge.s32.totalorder %s32_s22, 2  ;;  %s46_s23 = sadd.s32 1, %s830_s17 }
   0xc   : > { %p53_p1 = scmp.ne.s32.totalorder %s830_s17, %s826_s16  ;;  %p54_p2 = scmp.eq.s32.totalorder %s842_s20, 0 }
   0xd   : > { %s1033_s22 = smov (%p33_p0, %s32_s22), 0  ;;  %p59_p4 = scmp.ne.s32.totalorder %s826_s16, %s822_s15 }
   0xe   : > { %1021 = sst [smem:[#allocation15_spill]] %s1033_s22  ;;  %p55_p3 = por %p54_p2, %p53_p1 }
   0xf   : > { %s43_s24 = ssub.s32 %s838_s19, %s1033_s22  ;;  %p60_p5 = scmp.eq.s32.totalorder %s901_s21, 0 }
  0x10   : > { %p44_p6 = scmp.eq.s32.totalorder %s43_s24, 0  ;;  %p578_p8 = scmp.lt.s32.totalorder %s842_s20, 2 }
  0x11   : > { %p914_p7 = por %p60_p5, %p59_p4  ;;  %s195_s27 = sand.u32 1, %s830_s17  }
  0x12   : > { %s920_s26 = scalar_select %p44_p6, %s830_s17, %s46_s23  }
  0x13   : > { %s532_s28 = sshll.u32 %s838_s19, 3  ;;  %s531_s29 = sshll.u32 %s195_s27, 3 }
  0x14   : > { %p924_p9 = pnand %p578_p8, %p55_p3  ;;  %s216_s5 = sand.u32 1, %s842_s20  }
  0x15   : > { %s1024_s1 = sld [smem:[#allocation16_spill]]  ;;  %s220_s9 = scalar_lea.vmem [#allocation5], %s531_s29 }
  0x16   : > { %s230_s10 = sshll.u32 %s220_s9, 4  ;;  %p537_p10 = scmp.ge.s32.totalorder %s842_s20, 1  ;;  %s231_s10 = int_to_ptr.vmem [resolvable:$true] %s230_s10 }
  0x17   : > { %s217_s12 = scalar_lea.sflag [#allocation6], %s216_s5  ;;  %p256_p11 = scmp.lt.s32.totalorder %s842_s20, 3 }
  0x18   : > { %s205_s23 = scalar_lea.hbm %s1014_s0, %s532_s28  ;;  %s199_s24 = scalar_lea.vmem [#allocation2], %s531_s29 }
  0x19   : > { %p936_p12 = pnand %p537_p10, %p256_p11  ;;  %s209_s6 = sshll.u32 %s199_s24, 4  ;;  %s210_s6 = int_to_ptr.vmem [resolvable:$true] %s209_s6 }
  0x1a   : > { %s207_s7 = sshll.u32 %s205_s23, 4  ;;  %s262_s14 = sand.u32 (!%p936_p12), 1, %s826_s16   ;;  %s208_s7 = int_to_ptr.hbm [resolvable:$true] %s207_s7 }
  0x1b   : > { %s226_s8 = scalar_lea.hbm %s1024_s1, %s532_s28  ;;  %s263_s15 = scalar_lea.sflag (!%p936_p12), [#allocation3], %s262_s14 }
  0x1c   : > { %s228_s11 = sshll.u32 %s226_s8, 4  ;;  %s196_s8 = scalar_lea.sflag [#allocation3], %s195_s27  ;;  %s229_s11 = int_to_ptr.hbm [resolvable:$true] %s228_s11 }
  0x1d   : > { %574 = dma.hbm_to_vmem [thread:$0]  (!%p924_p9), %s229_s11, 128, %s231_s10, %s217_s12  }
  0x1e   : > { %571 = dma.hbm_to_vmem [thread:$0]  (!%p924_p9), %s208_s7, 128, %s210_s6, %s196_s8  }
  0x1f   : > { %s247_s10 = scalar_lea.hbm %s1016_s2, %s532_s28  ;;  %s241_s11 = scalar_lea.vmem [#allocation7], %s531_s29 }
  0x20   : > { %s251_s1 = sshll.u32 %s241_s11, 4  ;;  %s249_s22 = sshll.u32 %s247_s10, 4  ;;  %s252_s1 = int_to_ptr.vmem [resolvable:$true] %s251_s1  ;;  %s250_s22 = int_to_ptr.hbm [resolvable:$true] %s249_s22 }
  0x21   : > { %577 = dma.hbm_to_vmem [thread:$0]  (!%p924_p9), %s250_s22, 128, %s252_s1, %s217_s12  }
  0x22   : > { %260 = sbr.rel (%p936_p12) target bundleno = 100 (0x64), region = 32  ;;  %s953_s27 = sshll.u32 (!%p936_p12), %s262_s14, 3 }
  0x23   : > { %s266_s23 = scalar_lea.vmem (!%p936_p12), [#allocation2], %s953_s27 }
  0x27   : > { %805 = dma.done.wait (%p914_p7), %s263_s15, 128  }
  0x28   : > { %807 = vsyncadd (%p914_p7), %s263_s15, 4294967168  ;;  %s272_s1 = sand.u32 1, %s901_s21   ;;  %s276_s28 = scalar_lea.vmem [#allocation5], %s953_s27 }
  0x29   : > { %s273_s22 = scalar_lea.sflag [#allocation6], %s272_s1 }
  0x2a   : > { %809 = dma.done.wait (%p914_p7), %s273_s22, 256  }
  0x2b   : > { %811 = vsyncadd (%p914_p7), %s273_s22, 4294967040  ;;  %s286_s29 = scalar_lea.vmem [#allocation7], %s953_s27  ;;  %p541_p13 = scmp.ne.s32.totalorder %s834_s18, 0 }
  0x2d   : > { %326 = sbr.rel (%p541_p13) target bundleno = 53 (0x35), region = 48 }
  0x32   : > { %v844_v0 = vmov 0.0  }
  0x33   : > { %327 = vst [vmem:[#allocation8] sm:$0xff] %v844_v0 }
  0x34   : > { %328 = vst [vmem:[#allocation9] sm:$0xff] %v844_v0 }
  0x35 PF: > { %s552_s30 = sshll.u32 %s834_s18, 3 }
  0x36   : > { %s553_s12 = sadd.s32 8, %s552_s30 }
  0x37   : > { %p543_p0 = scmp.gt.s32.totalorder %s553_s12, 12 }
  0x39   : > { %337 = sbr.rel (%p543_p0) target bundleno = 71 (0x47), region = 52 }
  0x3e   : > { %v338_v1 = vld [vmem:[%s286_s29] sm:$0xff]  ;;  %v346_v4 = vld [vmem:[%s276_s28] sm:$0xff] }
  0x3f   : > { %v339_v2 = vld [vmem:[%s266_s23] sm:$0xff]  ;;  %v343_v5 = vld [vmem:[#allocation8] sm:$0xff]  ;;  %v347_v6 = vsub.f32 %v346_v4, %v338_v1  ;;  %v350_v8 = vld [vmem:[#allocation9] sm:$0xff] }
  0x40   : > { %v340_v3 = vsub.f32 %v339_v2, %v338_v1 }
  0x41   : > { %v348_v9 = vmul.f32 %v347_v6, %v347_v6 }
  0x42   : > { %v341_v7 = vmul.f32 %v340_v3, %v340_v3 }
  0x43   : > { %v351_v11 = vadd.f32 %v350_v8, %v348_v9 }
  0x44   : > { %v344_v10 = vadd.f32 %v343_v5, %v341_v7 }
  0x45   : > { %352 = vst [vmem:[#allocation9] sm:$0xff] %v351_v11 }
  0x46   : > { %345 = vst [vmem:[#allocation8] sm:$0xff] %v344_v10 }
  0x47 PF: > { %p544_p1 = scmp.le.s32.totalorder %s553_s12, 12 }
  0x49   : > { %355 = sbr.rel (%p544_p1) target bundleno = 90 (0x5a), region = 56 }
  0x4e   : > { %v356_v12 = vlaneseq  ;;  %v362_v13 = vld [vmem:[%s286_s29] sm:$0xff]  ;;  %v359_v15 = vstv %s552_s30  ;;  %v371_v17 = vld [vmem:[%s276_s28] sm:$0xff] }
  0x4f   : > { %v363_v14 = vld [vmem:[%s266_s23] sm:$0xff]  ;;  %v372_v19 = vsub.f32 %v371_v17, %v362_v13  ;;  %v368_v23 = vld [vmem:[#allocation8] sm:$0xff]  ;;  %v376_v24 = vld [vmem:[#allocation9] sm:$0xff] }
  0x50   : > { %v364_v16 = vsub.f32 %v363_v14, %v362_v13  ;;  %v357_v18 = vshrl.u32 %v356_v12, 7 }
  0x51   : > { %v373_v22 = vmul.f32 %v372_v19, %v372_v19 }
  0x52   : > { %v365_v20 = vmul.f32 %v364_v16, %v364_v16  ;;  %v360_v21 = vadd.s32 %v359_v15, %v357_v18 }
  0x54   : > { %vm361_vm0 = vcmp.lt.s32.totalorder %v360_v21, 12 }
  0x55   : > { %v366_v25 = vsel %vm361_vm0, %v365_v20, 0.0  ;;  %v374_v26 = vsel %vm361_vm0, %v373_v22, 0.0 }
  0x56   : > { %v369_v27 = vadd.f32 %v368_v23, %v366_v25  ;;  %v377_v28 = vadd.f32 %v376_v24, %v374_v26 }
  0x58   : > { %370 = vst [vmem:[#allocation8] sm:$0xff] %v369_v27 }
  0x59   : > { %378 = vst [vmem:[#allocation9] sm:$0xff] %v377_v28 }
  0x5a PF: > { %p579_p2 = scmp.eq.s32.totalorder %s901_s21, 1  ;;  %s389_s13 = sshll.u32 %s1017_s3, 4  ;;  %s390_s13 = int_to_ptr.hbm [resolvable:$true] %s389_s13 }
  0x5b   : > { %s845_s24 = smov [#allocation8]   ;;  %s846_s7 = smov [#allocation9]  }
  0x5c   : > { %s387_s6 = sshll.u32 %s845_s24, 4  ;;  %s401_s8 = sshll.u32 %s846_s7, 4  ;;  %s388_s6 = int_to_ptr.vmem [resolvable:$true] %s387_s6  ;;  %s402_s8 = int_to_ptr.vmem [resolvable:$true] %s401_s8 }
  0x5d   : > { %561 = dma.vmem_to_hbm [thread:$0]  (%p579_p2), %s388_s6, 128, %s390_s13, [#allocation4]  }
  0x5e   : > { %s403_s10 = sshll.u32 %s1018_s4, 4  ;;  %s404_s10 = int_to_ptr.hbm [resolvable:$true] %s403_s10 }
  0x5f   : > { %563 = dma.vmem_to_hbm [thread:$0]  (%p579_p2), %s402_s8, 128, %s404_s10, [#allocation10]  }
  0x60   : > { %813 = dma.done.wait (%p579_p2), [#allocation4], 128  }
  0x61   : > { %815 = vsyncadd (%p579_p2), [#allocation4], 4294967168 }
  0x62   : > { %817 = dma.done.wait (%p579_p2), [#allocation10], 128  }
  0x63   : > { %819 = vsyncadd (%p579_p2), [#allocation10], 4294967168 }
  0x64 PF: > { %s23_s20 = sadd.s32 1, %s842_s20   ;;  %s1026_s11 = sld [smem:[#allocation15_spill]] }
  0x65   : > { %p20_p3 = scmp.ge.s32.totalorder %s23_s20, 4   ;;  %s1027_s15 = smov %s826_s16 }
  0x66   : > { %s1028_s16 = smov %s830_s17  ;;  %s1029_s17 = smov %s920_s26 }
  0x67   : > { %s1030_s18 = smov %s838_s19  ;;  %22 = sbr.rel (!%p20_p3) target bundleno = 10 (0xa), region = 115 }
  0x6a   : > { %s1031_s19 = smov %s1026_s11 }
  0x6c   :  { %422 = vsyncpa [#allocation3], 1 }
  0x6d   :  { %424 = vsyncpa [#allocation3 + $0x1], 1 }
  0x6e   :  { %425 = vsyncpa [#allocation6], 1 }
  0x6f   :  { %427 = vsyncpa [#allocation6 + $0x1], 1 }
  0x70   :  { %428 = vsyncpa [#allocation4], 1 }
  0x71   :  { %430 = vsyncpa [#allocation4 + $0x1], 1 }
  0x72   :  { %431 = vsyncpa [#allocation10], 1 }

</bundles_post_ra>
